<compile_context>
chip_gen: v5e
topology: v5e:2x2
jax: 0.10.0
libtpu: 0.0.40
codegen_flags: <defaults>
</compile_context>

<pallas_src>
import jax
import jax.numpy as jnp
from jax.experimental import pallas as pl
from jax.experimental.pallas import tpu as pltpu


def _round_up(x, m):
    return (x + m - 1) // m * m


def _pick_tile(total, candidates):
    for c in candidates:
        if total % c == 0:
            return c
    return total


def _vmem_capacity_bytes():
    """Per-core VMEM capacity; conservative fallback if the query fails."""
    try:
        cap = int(getattr(pltpu.get_tpu_info(), "vmem_capacity_bytes", 0))
        if cap > 0:
            return cap
    except Exception:
        pass
    return 64 << 20  # v7x-sized fallback (safe on every generation)


def gated_linear_kernel(x_ref, w_ref, b_ref, o_ref, acc_ref):
    """One (n_tile, batch_tile, k_tile) grid point.

    x_ref:   [tb, tk]    activation tile (compute dtype)
    w_ref:   [tk, 2*tn]  fused [W_lin^T | W_gate^T] block for this (k, n) tile
    b_ref:   [1, 2*tn]   fused biases (f32)
    o_ref:   [tb, tn]    output tile (lane-dense, tn multiple of 128)
    acc_ref: [tb, 2*tn]  f32 accumulator scratch (persists across K steps)
    """
    k = pl.program_id(2)

    @pl.when(k == 0)
    def _init():
        acc_ref[...] = jnp.zeros_like(acc_ref)

    # Single fused MXU matmul covering both branches for this K slice.
    acc_ref[...] += jnp.dot(x_ref[...], w_ref[...],
                            preferred_element_type=jnp.float32)

    @pl.when(k == pl.num_programs(2) - 1)
    def _epilogue():
        tn = o_ref.shape[-1]
        fused = acc_ref[...] + b_ref[...]          # f32 bias add
        lin = fused[:, :tn]                        # lane slice at 128-boundary
        gate = fused[:, tn:]
        # exp + approx reciprocal both go to the EUP slot; VPU stays free.
        sig = pl.reciprocal(1.0 + jnp.exp(-gate), approx=True)
        o_ref[...] = (lin * sig).astype(o_ref.dtype)


def prepare_gated_linear_params(w_lin, b_lin, w_gate, b_gate, *,
                                tn=None, compute_dtype=jnp.bfloat16):
    """Fuse + pad PyTorch-layout params ONCE, outside the per-call hot path.

    w_*: [N, K] (nn.Linear layout), b_*: [N].
    Returns (fused_w [Kp, 2*Np], fused_b [1, 2*Np], meta).  For n-tile j the
    fused columns [j*2tn : j*2tn+tn] hold the linear branch and
    [j*2tn+tn : (j+1)*2tn] the gate branch.
    """
    N, K = w_lin.shape
    Kp = _round_up(K, 128)
    Np = _round_up(N, 128)
    if tn is None:
        tn = _pick_tile(Np, (512, 256, 128))
    assert Np % tn == 0
    nt = Np // tn

    wdtype = jnp.dtype(compute_dtype if compute_dtype is not None
                       else w_lin.dtype)

    def pad_wt(w):
        return jnp.pad(w.T, ((0, Kp - K), (0, Np - N))).astype(wdtype)

    wlt = pad_wt(w_lin).reshape(Kp, nt, tn)
    wgt = pad_wt(w_gate).reshape(Kp, nt, tn)
    fused_w = jnp.concatenate([wlt, wgt], axis=2).reshape(Kp, 2 * Np)

    blp = jnp.pad(b_lin.astype(jnp.float32), (0, Np - N)).reshape(nt, tn)
    bgp = jnp.pad(b_gate.astype(jnp.float32), (0, Np - N)).reshape(nt, tn)
    fused_b = jnp.concatenate([blp, bgp], axis=1).reshape(1, 2 * Np)

    meta = dict(N=N, K=K, Kp=Kp, Np=Np, tn=tn, wdtype=wdtype)
    return fused_w, fused_b, meta


def gated_linear_fused(x, fused_w, fused_b, meta, *, tb=None, tk=None):
    """x: [B, K].  fused_w/fused_b/meta from prepare_gated_linear_params."""
    B, K = x.shape
    assert K == meta["K"], "in_features mismatch"
    Kp, Np, tn = meta["Kp"], meta["Np"], meta["tn"]
    nt = Np // tn
    xdtype = meta["wdtype"]          # keep x compute dtype == weight dtype
    out_dtype = x.dtype

    x_ws = jnp.dtype(xdtype).itemsize
    w_ws = jnp.dtype(fused_w.dtype).itemsize
    o_ws = jnp.dtype(out_dtype).itemsize
    sub = 16 if x_ws == 2 else 8

    # ---- batch tiling: pad B UP to the tile (never collapse to tb=8) ----
    Bp = _round_up(B, sub)
    if tb is None:
        tb = Bp if Bp <= 512 else 256
    tb = _round_up(max(sub, min(tb, Bp)), sub)
    Bp = _round_up(Bp, tb)
    nb = Bp // tb

    # ---- K tiling ----
    if tk is None:
        tk = _pick_tile(Kp, (1024, 512, 256, 128))
    assert Kp % tk == 0

    # ---- generation-aware VMEM budget (includes scratch + f32 temps) ----
    usable = _vmem_capacity_bytes() - (8 << 20)

    def budget(tb_, tk_, tn_):
        dbl = 2 * (tb_ * tk_ * x_ws          # x tile        (double-buffered)
                   + tk_ * 2 * tn_ * w_ws    # fused-W block (double-buffered)
                   + 2 * tn_ * 4             # fused bias    (double-buffered)
                   + tb_ * tn_ * o_ws)       # out tile      (double-buffered)
        acc = tb_ * 2 * tn_ * 4               # accumulator scratch
        epi = 3 * tb_ * 2 * tn_ * 4           # f32 epilogue temporaries
        return dbl + acc + epi

    while budget(tb, tk, tn) > usable and tk > 128:
        tk //= 2                      # halving keeps Kp % tk == 0
    nk = Kp // tk
    vmem_limit = int(min(max(budget(tb, tk, tn) + (4 << 20), 16 << 20),
                         max(usable, 16 << 20)))

    xp = jnp.pad(x, ((0, Bp - B), (0, Kp - K))).astype(xdtype)

    # ---- grid order by HBM traffic (K innermost either way) ----
    x_bytes = Bp * Kp * x_ws
    w_bytes = Kp * 2 * Np * w_ws
    # n-outer streams W once but re-reads X nt times; batch-outer vice versa.
    n_outer = (w_bytes + x_bytes * nt) <= (x_bytes + w_bytes * nb)

    if n_outer:
        grid = (nt, nb, nk)
        x_map = lambda j, i, k: (i, k)
        w_map = lambda j, i, k: (k, j)
        b_map = lambda j, i, k: (0, j)
        o_map = lambda j, i, k: (i, j)
    else:
        grid = (nb, nt, nk)
        x_map = lambda i, j, k: (i, k)
        w_map = lambda i, j, k: (k, j)
        b_map = lambda i, j, k: (0, j)
        o_map = lambda i, j, k: (i, j)

    out = pl.pallas_call(
        gated_linear_kernel,
        out_shape=jax.ShapeDtypeStruct((Bp, Np), out_dtype),
        grid_spec=pltpu.PrefetchScalarGridSpec(
            num_scalar_prefetch=0,
            grid=grid,
            in_specs=[
                pl.BlockSpec((tb, tk), x_map),          # x tile
                pl.BlockSpec((tk, 2 * tn), w_map),      # fused W block
                pl.BlockSpec((1, 2 * tn), b_map),       # fused bias
            ],
            out_specs=pl.BlockSpec((tb, tn), o_map),
            scratch_shapes=[pltpu.VMEM((tb, 2 * tn), jnp.float32)],
        ),
        compiler_params=pltpu.CompilerParams(
            dimension_semantics=("parallel", "parallel", "arbitrary"),
            vmem_limit_bytes=vmem_limit,
        ),
    )(xp, fused_w, fused_b)

    return out[:B, : meta["N"]]


def gated_linear(x, w_lin, b_lin, w_gate, b_gate, *, tb=None, tk=None,
                 tn=None, compute_dtype=jnp.bfloat16):
    """Convenience one-shot wrapper (param prep should be hoisted in real use)."""
    fused_w, fused_b, meta = prepare_gated_linear_params(
        w_lin, b_lin, w_gate, b_gate, tn=tn, compute_dtype=compute_dtype)
    return gated_linear_fused(x, fused_w, fused_b, meta, tb=tb, tk=tk)


def gated_linear_ref(x, w_lin, b_lin, w_gate, b_gate):
    lin = x @ w_lin.T + b_lin
    gate = x @ w_gate.T + b_gate
    return lin * jax.nn.sigmoid(gate)


def _make_params(key, in_features, out_features):
    # Mimics nn.Linear's uniform(-1/sqrt(in), 1/sqrt(in)) init, deterministically.
    kw1, kb1, kw2, kb2 = jax.random.split(key, 4)
    bound = 1.0 / (in_features ** 0.5)
    u = lambda k, s: jax.random.uniform(k, s, minval=-bound, maxval=bound,
                                        dtype=jnp.float32)
    return (u(kw1, (out_features, in_features)), u(kb1, (out_features,)),
            u(kw2, (out_features, in_features)), u(kb2, (out_features,)))


if __name__ == "__main__":
    key = jax.random.PRNGKey(0)
    k0, k1, k2, k3 = jax.random.split(key, 4)

    # --- test 1: small shapes, default bf16 compute (MXU-native path) ---
    B, K, N = 8, 32, 32
    x = jax.random.normal(k0, (B, K), dtype=jnp.float32)
    w_lin, b_lin, w_gate, b_gate = _make_params(k1, K, N)

    fused_w, fused_b, meta = prepare_gated_linear_params(
        w_lin, b_lin, w_gate, b_gate)            # bf16 weights by default
    out = jax.block_until_ready(gated_linear_fused(x, fused_w, fused_b, meta))
    ref = gated_linear_ref(x, w_lin, b_lin, w_gate, b_gate)
    assert out.shape == (B, N)
    assert jnp.allclose(out, ref, atol=3e-2, rtol=3e-2), \
        "bf16 path mismatch vs reference"

    # --- test 2: awkward shapes (batch/K/N padding, multi-tile grid,
    #             K-axis accumulator) with f32 compute, tighter tolerance ---
    B2, K2, N2 = 40, 300, 520
    x2 = jax.random.normal(k2, (B2, K2), dtype=jnp.float32)
    params2 = _make_params(k3, K2, N2)
    out2 = jax.block_until_ready(
        gated_linear(x2, *params2, compute_dtype=jnp.float32))
    ref2 = gated_linear_ref(x2, *params2)
    assert out2.shape == (B2, N2)
    assert jnp.allclose(out2, ref2, atol=5e-3, rtol=5e-3), \
        "f32 path mismatch vs reference"

    print("KERNEL_OK")
</pallas_src>

<mosaic_0001>
module attributes {stable_mosaic.version = 11 : i64} {
  func.func @gated_linear_kernel(%arg0: i32, %arg1: i32, %arg2: i32, %arg3: memref<16x128xbf16, #tpu.memory_space<vmem>>, %arg4: memref<128x256xbf16, #tpu.memory_space<vmem>>, %arg5: memref<1x256xf32, #tpu.memory_space<vmem>>, %arg6: memref<16x128xf32, #tpu.memory_space<vmem>>, %arg7: memref<16x256xf32, #tpu.memory_space<vmem>>) attributes {dimension_semantics = [#tpu.dimension_semantics<parallel>, #tpu.dimension_semantics<parallel>, #tpu.dimension_semantics<arbitrary>], iteration_bounds = array<i64: 1, 1, 1>, scalar_prefetch = 0 : i64, scratch_operands = 1 : i64, tpu.core_type = #tpu.core_type<tc>, window_params = [{transform_indices = @transform_0, window_bounds = array<i64: 16, 128>}, {transform_indices = @transform_1, window_bounds = array<i64: 128, 256>}, {transform_indices = @transform_2, window_bounds = array<i64: 1, 256>}, {transform_indices = @transform_3, window_bounds = array<i64: 16, 128>}]} {
    %c0_i32 = arith.constant 0 : i32
    %0 = arith.cmpi eq, %arg2, %c0_i32 : i32
    %1 = arith.extui %0 : i1 to i32
    %c0_i32_0 = arith.constant 0 : i32
    %2 = arith.cmpi ne, %1, %c0_i32_0 : i32
    scf.if %2 {
      %cst_10 = arith.constant 0.000000e+00 : f32
      %12 = vector.broadcast %cst_10 : f32 to vector<16x256xf32>
      %c0_11 = arith.constant 0 : index
      %c0_12 = arith.constant 0 : index
      %13 = vector.load %arg7[%c0_11, %c0_12] : memref<16x256xf32, #tpu.memory_space<vmem>>, vector<16x256xf32>
      tpu.vector_store %arg7[%c0_11, %c0_12], %12 {strides = array<i32>} : memref<16x256xf32, #tpu.memory_space<vmem>>, vector<16x256xf32>,
    } else {
    }
    %c0 = arith.constant 0 : index
    %c0_1 = arith.constant 0 : index
    %3 = vector.load %arg7[%c0, %c0_1] : memref<16x256xf32, #tpu.memory_space<vmem>>, vector<16x256xf32>
    %c0_2 = arith.constant 0 : index
    %c0_3 = arith.constant 0 : index
    %4 = vector.load %arg3[%c0_2, %c0_3] : memref<16x128xbf16, #tpu.memory_space<vmem>>, vector<16x128xbf16>
    %c0_4 = arith.constant 0 : index
    %c0_5 = arith.constant 0 : index
    %5 = vector.load %arg4[%c0_4, %c0_5] : memref<128x256xbf16, #tpu.memory_space<vmem>>, vector<128x256xbf16>
    %cst = arith.constant dense<0.000000e+00> : vector<16x256xf32>
    %6 = tpu.matmul %4, %5, %cst {dimension_numbers = #tpu.dot_dimension_numbers<[1], [0], [0], [1], [0, 0, 1, 1], [], []>} : vector<16x128xbf16>, vector<128x256xbf16>, vector<16x256xf32> -> vector<16x256xf32>
    %7 = arith.addf %3, %6 : vector<16x256xf32>
    %c0_6 = arith.constant 0 : index
    %c0_7 = arith.constant 0 : index
    %8 = vector.load %arg7[%c0_6, %c0_7] : memref<16x256xf32, #tpu.memory_space<vmem>>, vector<16x256xf32>
    tpu.vector_store %arg7[%c0_6, %c0_7], %7 {strides = array<i32>} : memref<16x256xf32, #tpu.memory_space<vmem>>, vector<16x256xf32>,
    %c0_i32_8 = arith.constant 0 : i32
    %9 = arith.cmpi eq, %arg2, %c0_i32_8 : i32
    %10 = arith.extui %9 : i1 to i32
    %c0_i32_9 = arith.constant 0 : i32
    %11 = arith.cmpi ne, %10, %c0_i32_9 : i32
    scf.if %11 {
      %c0_10 = arith.constant 0 : index
      %c0_11 = arith.constant 0 : index
      %12 = vector.load %arg7[%c0_10, %c0_11] : memref<16x256xf32, #tpu.memory_space<vmem>>, vector<16x256xf32>
      %c0_12 = arith.constant 0 : index
      %c0_13 = arith.constant 0 : index
      %13 = vector.load %arg5[%c0_12, %c0_13] : memref<1x256xf32, #tpu.memory_space<vmem>>, vector<1x256xf32>
      %14 = vector.broadcast %13 : vector<1x256xf32> to vector<16x256xf32>
      %15 = arith.addf %12, %14 : vector<16x256xf32>
      %16 = vector.extract_strided_slice %15 {offsets = [0, 0], sizes = [16, 128], strides = [1, 1]} : vector<16x256xf32> to vector<16x128xf32>
      %17 = vector.extract_strided_slice %15 {offsets = [0, 128], sizes = [16, 128], strides = [1, 1]} : vector<16x256xf32> to vector<16x128xf32>
      %cst_14 = arith.constant 0.000000e+00 : f32
      %18 = vector.broadcast %cst_14 : f32 to vector<16x128xf32>
      %19 = arith.subf %18, %17 : vector<16x128xf32>
      %20 = math.exp %19 : vector<16x128xf32>
      %cst_15 = arith.constant 1.000000e+00 : f32
      %21 = vector.broadcast %cst_15 : f32 to vector<16x128xf32>
      %22 = arith.addf %21, %20 : vector<16x128xf32>
      %23 = tpu.reciprocal %22 {approx = true} : vector<16x128xf32> -> vector<16x128xf32>
      %24 = arith.mulf %16, %23 : vector<16x128xf32>
      %c0_16 = arith.constant 0 : index
      %c0_17 = arith.constant 0 : index
      %25 = vector.load %arg6[%c0_16, %c0_17] : memref<16x128xf32, #tpu.memory_space<vmem>>, vector<16x128xf32>
      tpu.vector_store %arg6[%c0_16, %c0_17], %24 {strides = array<i32>} : memref<16x128xf32, #tpu.memory_space<vmem>>, vector<16x128xf32>,
    } else {
    }
    return
  }
  func.func @transform_0(%arg0: i32, %arg1: i32, %arg2: i32) -> (i32, i32) {
    %c0_i32 = arith.constant 0 : i32
    return %arg1, %arg2 : i32, i32
  }
  func.func @transform_1(%arg0: i32, %arg1: i32, %arg2: i32) -> (i32, i32) {
    %c0_i32 = arith.constant 0 : i32
    return %arg2, %arg0 : i32, i32
  }
  func.func @transform_2(%arg0: i32, %arg1: i32, %arg2: i32) -> (i32, i32) {
    %c0_i32 = arith.constant 0 : i32
    %c0_i32_0 = arith.constant 0 : i32
    return %c0_i32, %arg0 : i32, i32
  }
  func.func @transform_3(%arg0: i32, %arg1: i32, %arg2: i32) -> (i32, i32) {
    %c0_i32 = arith.constant 0 : i32
    return %arg1, %arg0 : i32, i32
  }
}

</mosaic_0001>

<bundles_post_ra>
// kernel: tpu_custom_call.1
= control target key start
LH: loop header
LB: loop body
LE: loop exit
PB: predicated region body
PF: predicated region fallthrough
CT: control target
= control target key end

     0   :  { %8 = vsyncpa [#allocation4], 0  ;;  %s512_s0 = inlined_call_operand.hbm [shape: bf16[16,128], index: 0, kind: input, shape index: {}]   ;;  %s513_s1 = inlined_call_operand.hbm [shape: bf16[128,256], index: 1, kind: input, shape index: {}]   ;;  %s514_s2 = inlined_call_operand.hbm [shape: f32[1,256], index: 2, kind: input, shape index: {}]   ;;  %s515_s3 = inlined_call_operand.hbm [shape: f32[16,128], index: 3, kind: output, shape index: {}]  }
   0x1   :  { %9 = vsyncpa [#allocation7], 0  ;;  %s28_s14 = sshll.u32 %s513_s1, 4  ;;  %s29_s14 = int_to_ptr.hbm [resolvable:$true] %s28_s14 }
   0x2   :  { %10 = vsyncpa [#allocation5], 0  ;;  %s466_s15 = smov [#allocation6]   ;;  %s15_s19 = sshll.u32 %s512_s0, 4  ;;  %s16_s19 = int_to_ptr.hbm [resolvable:$true] %s15_s19 }
   0x3   :  { %s30_s16 = sshll.u32 %s466_s15, 4  ;;  %s467_s20 = smov 128   ;;  %s31_s16 = int_to_ptr.vmem [resolvable:$true] %s30_s16 }
   0x4   :  { %s468_s21 = smov 8   ;;  %s469_s22 = smov [#allocation3]  }
   0x5   :  { %36 = dma.hbm_to_vmem [thread:$0]  %s29_s14, 2048, %s31_s16, [#allocation7], %s467_s20, %s467_s20, %s468_s21  }
   0x6   :  { %s17_s23 = sshll.u32 %s469_s22, 4  ;;  %s470_s1 = smov 64   ;;  %s18_s23 = int_to_ptr.vmem [resolvable:$true] %s17_s23 }
   0x7   :  { %s471_s24 = smov 4   ;;  %s42_s27 = sshll.u32 %s514_s2, 4  ;;  %s43_s27 = int_to_ptr.hbm [resolvable:$true] %s42_s27 }
   0x8   :  { %23 = dma.hbm_to_vmem [thread:$0]  %s16_s19, 128, %s18_s23, [#allocation4], %s470_s1, %s470_s1, %s471_s24  }
   0x9   :  { %s472_s28 = smov [#allocation8]  }
   0xa   :  { %s44_s0 = sshll.u32 %s472_s28, 4  ;;  %s45_s0 = int_to_ptr.vmem [resolvable:$true] %s44_s0 }
   0xb   :  { %47 = dma.hbm_to_vmem [thread:$0]  %s43_s27, 32, %s45_s0, [#allocation7]  }
   0xc   :  { %460 = dma.done.wait [#allocation4], 128  }
   0xd   :  { %461 = vsyncadd [#allocation4], 4294967168 }
   0xe   :  { %462 = dma.done.wait [#allocation7], 2080  }
   0xf   :  { %463 = vsyncadd [#allocation7], 4294965216  ;;  %v346_v0 = vld [vmem:[#allocation6 + $0x74] sm:$0xf]  ;;  %v327_v1 = vld [vmem:[#allocation6 + $0x78] sm:$0xf0] }
  0x10   :  { %v344_v2 = vld [vmem:[#allocation6 + $0x64] sm:$0xf]  ;;  %v330_v3 = vor.u32 %v346_v0, %v327_v1  ;;  %v319_v4 = vld [vmem:[#allocation6 + $0x68] sm:$0xf0]  ;;  %v325_v5 = vld [vmem:[#allocation6 + $0x70] sm:$0xf] }
  0x11   :  { %v347_v6 = vld [vmem:[#allocation6 + $0x74] sm:$0xf0]  ;;  %v322_v7 = vor.u32 %v344_v2, %v319_v4  ;;  %v317_v9 = vld [vmem:[#allocation6 + $0x60] sm:$0xf]  ;;  %v345_v10 = vld [vmem:[#allocation6 + $0x64] sm:$0xf0] }
  0x12   :  { %190 = vmatpush.bf16.msra.mxu1 %v330_v3  ;;  %v326_v8 = vor.u32 %v347_v6, %v325_v5  ;;  %v342_v11 = vld [vmem:[#allocation6 + $0x54] sm:$0xf]  ;;  %v311_v12 = vld [vmem:[#allocation6 + $0x58] sm:$0xf0]  ;;  %v318_v13 = vor.u32 %v345_v10, %v317_v9  ;;  %v309_v14 = vld [vmem:[#allocation6 + $0x50] sm:$0xf] }
  0x13   :  { %v343_v15 = vld [vmem:[#allocation6 + $0x54] sm:$0xf0]  ;;  %v314_v16 = vor.u32 %v342_v11, %v311_v12  ;;  %v340_v17 = vld [vmem:[#allocation6 + $0x44] sm:$0xf]  ;;  %v303_v18 = vld [vmem:[#allocation6 + $0x48] sm:$0xf0] }
  0x14   :  { %176 = vmatpush.bf16.msra.mxu0 %v326_v8  ;;  %v310_v19 = vor.u32 %v343_v15, %v309_v14  ;;  %v301_v20 = vld [vmem:[#allocation6 + $0x40] sm:$0xf]  ;;  %v341_v21 = vld [vmem:[#allocation6 + $0x44] sm:$0xf0]  ;;  %v306_v22 = vor.u32 %v340_v17, %v303_v18  ;;  %v338_v23 = vld [vmem:[#allocation6 + $0x34] sm:$0xf] }
  0x15   :  { %v295_v24 = vld [vmem:[#allocation6 + $0x38] sm:$0xf0]  ;;  %v302_v25 = vor.u32 %v341_v21, %v301_v20  ;;  %v293_v26 = vld [vmem:[#allocation6 + $0x30] sm:$0xf]  ;;  %v339_v27 = vld [vmem:[#allocation6 + $0x34] sm:$0xf0] }
  0x16   :  { %191 = vmatpush.bf16.msra.mxu1 %v322_v7  ;;  %v298_v28 = vor.u32 %v338_v23, %v295_v24  ;;  %v336_v29 = vld [vmem:[#allocation6 + $0x24] sm:$0xf]  ;;  %v287_v30 = vld [vmem:[#allocation6 + $0x28] sm:$0xf0]  ;;  %v294_v31 = vor.u32 %v339_v27, %v293_v26  ;;  %v285_v32 = vld [vmem:[#allocation6 + $0x20] sm:$0xf] }
  0x17   :  { %v337_v33 = vld [vmem:[#allocation6 + $0x24] sm:$0xf0]  ;;  %v290_v34 = vor.u32 %v336_v29, %v287_v30  ;;  %v334_v35 = vld [vmem:[#allocation6 + $0x14] sm:$0xf]  ;;  %v279_v36 = vld [vmem:[#allocation6 + $0x18] sm:$0xf0] }
  0x18   :  { %177 = vmatpush.bf16.msra.mxu0 %v318_v13  ;;  %v286_v37 = vor.u32 %v337_v33, %v285_v32  ;;  %v277_v38 = vld [vmem:[#allocation6 + $0x10] sm:$0xf]  ;;  %v335_v39 = vld [vmem:[#allocation6 + $0x14] sm:$0xf0]  ;;  %v282_v40 = vor.u32 %v334_v35, %v279_v36  ;;  %v332_v41 = vld [vmem:[#allocation6 + $0x4] sm:$0xf] }
  0x19   :  { %v271_v42 = vld [vmem:[#allocation6 + $0x8] sm:$0xf0]  ;;  %v278_v43 = vor.u32 %v335_v39, %v277_v38  ;;  %v269_v44 = vld [vmem:[#allocation6] sm:$0xf]  ;;  %v333_v45 = vld [vmem:[#allocation6 + $0x4] sm:$0xf0] }
  0x1a   :  { %192 = vmatpush.bf16.msra.mxu1 %v314_v16  ;;  %v274_v46 = vor.u32 %v332_v41, %v271_v42  ;;  %v270_v47 = vor.u32 %v333_v45, %v269_v44  ;;  %v331_v48 = vld [vmem:[#allocation3] sm:$0xff]  ;;  %v219_v49 = vld [vmem:[#allocation8] sm:$0x3]  ;;  %s473_s2 = smov [#allocation9]   ;;  %s249_s5 = sshll.u32 %s515_s3, 4  ;;  %s250_s5 = int_to_ptr.hbm [resolvable:$true] %s249_s5 }
  0x1b   :  { %v222_v50 = vperm.slane %v219_v49, 1  ;;  %v221_v61 = vperm.slane %v219_v49, 0  ;;  %s247_s29 = sshll.u32 %s473_s2, 4  ;;  %s248_s29 = int_to_ptr.vmem [resolvable:$true] %s247_s29 }
  0x1c   :  { %178 = vmatpush.bf16.msra.mxu0 %v310_v19 }
  0x1e   :  { %193 = vmatpush.bf16.msra.mxu1 %v306_v22 }
  0x20   :  { %179 = vmatpush.bf16.msra.mxu0 %v302_v25 }
  0x22   :  { %194 = vmatpush.bf16.msra.mxu1 %v298_v28 }
  0x24   :  { %180 = vmatpush.bf16.msra.mxu0 %v294_v31 }
  0x26   :  { %195 = vmatpush.bf16.msra.mxu1 %v290_v34 }
  0x28   :  { %181 = vmatpush.bf16.msra.mxu0 %v286_v37 }
  0x2a   :  { %196 = vmatpush.bf16.msra.mxu1 %v282_v40 }
  0x2c   :  { %182 = vmatpush.bf16.msra.mxu0 %v278_v43 }
  0x2e   :  { %197 = vmatpush.bf16.msra.mxu1 %v274_v46 }
  0x30   :  { %183 = vmatpush.bf16.msra.mxu0 %v270_v47 }
  0x31   :  { %198 = vmatmul.bf16.vlgmr.msra.gmra.mxu1 %v331_v48 }
  0x33   :  { %184 = vmatmul.bf16.vlgmr.msra.gmra.mxu0 %v331_v48 }
  0xae   :  { %v199_v51 = vpop.f32.mrf.mxu1 }
  0xaf   :  { %v226_v52 = vadd.f32 %v222_v50, %v199_v51 }
  0xb0   :  { %v185_v62 = vpop.f32.mrf.mxu0 }
  0xb1   :  { %v229_v53 = vsub.f32 0.0, %v226_v52  ;;  %v225_v63 = vadd.f32 %v221_v61, %v185_v62 }
  0xb3   :  { %v231_v54 = vmul.f32 1.442695, %v229_v53 }
  0xb5   :  { %356 = vpow2.f32 %v231_v54 }
  0xb6   :  { %v201_v55 = vpop.f32.mrf.mxu1 }
  0xb7   :  { %v228_v56 = vadd.f32 %v222_v50, %v201_v55 }
  0xb8   :  { %v187_v4 = vpop.f32.mrf.mxu0 }
  0xb9   :  { %v230_v57 = vsub.f32 0.0, %v228_v56  ;;  %v227_v5 = vadd.f32 %v221_v61, %v187_v4 }
  0xbb   :  { %v357_v58 = vpop.eup %356  ;;  %v233_v59 = vmul.f32 1.442695, %v230_v57 }
  0xbc   :  { %v235_v60 = vadd.f32 1.0, %v357_v58 }
  0xbd   :  { %358 = vpow2.f32 %v233_v59 }
  0xbe   :  { %360 = vrcp.f32 %v235_v60 }
  0xc3   :  { %v359_v0 = vpop.eup %358 }
  0xc4   :  { %v361_v1 = vpop.eup %360  ;;  %v236_v2 = vadd.f32 1.0, %v359_v0 }
  0xc5   :  { %v239_v3 = vmul.f32 %v361_v1, %v225_v63 }
  0xc6   :  { %362 = vrcp.f32 %v236_v2 }
  0xc7   :  { %241 = vst [vmem:[#allocation9] sm:$0xff] %v239_v3 }
  0xcc   :  { %v363_v6 = vpop.eup %362 }
  0xcd   :  { %v240_v7 = vmul.f32 %v363_v6, %v227_v5 }
  0xcf   :  { %242 = vst [vmem:[#allocation9 + $0x8] sm:$0xff] %v240_v7 }
  0xd0   :  { %255 = dma.vmem_to_hbm [thread:$0]  %s248_s29, 256, %s250_s5, [#allocation5], %s467_s20, %s467_s20, %s468_s21  }
  0xd1   :  { %464 = dma.done.wait [#allocation5], 256  }
  0xd2   :  { %465 = vsyncadd [#allocation5], 4294967040 }
  0xd3   :  { %260 = vsyncpa [#allocation4], 1 }
  0xd4   :  { %261 = vsyncpa [#allocation7], 1 }
  0xd5   :  { %262 = vsyncpa [#allocation5], 1 }

</bundles_post_ra>
